<compile_context>
chip_gen: v7x
topology: tpu7x:2x2x1
jax: 0.10.0
libtpu: 0.0.40
codegen_flags: <defaults>
</compile_context>

<pallas_src>
import math
from collections import OrderedDict

import jax
import jax.numpy as jnp
from jax.experimental import pallas as pl
from jax.experimental.pallas import tpu as pltpu


def _round_up(n, m):
    return ((n + m - 1) // m) * m


# ---------------------------------------------------------------------------
# Fused DAG kernel (generated from the static DAG structure)
# ---------------------------------------------------------------------------
def _make_dag_kernel(dag_meta, slot_w, f0_pad, tb, need_zero):
    """dag_meta : list (per layer, DAG order) of (runs, fout_pad) where
                  runs = tuple of (start_position, run_len); each run reads
                  act_ref[:, start*slot_w : (start+run_len)*slot_w].
       slot_w   : lane width of one activation slot (multiple of 128).
       f0_pad   : padded input feature width.
       tb       : batch tile (rows per grid step)."""
    n_layers = len(dag_meta)
    n_w = sum(len(runs) for runs, _ in dag_meta)

    def kernel(*refs):
        x_ref = refs[0]                                  # (tb, f0_pad) f32
        w_refs = refs[1:1 + n_w]                         # fused bf16 slabs
        b_refs = refs[1 + n_w:1 + n_w + n_layers]        # f32 biases (1, Fout_pad)
        out_ref = refs[1 + n_w + n_layers]
        act_ref = refs[1 + n_w + n_layers + 1]           # (tb, n_slots*slot_w) bf16

        # Only needed when some layer is narrower than its slot (keeps the
        # unused pad lanes at exactly zero so they never feed NaN/Inf garbage
        # into a later dot; the matching weight rows are zero anyway).
        if need_zero:
            act_ref[...] = jnp.zeros_like(act_ref)

        # Slot 0 <- input; f32 -> bf16 cast happens on the VPU (free slack).
        act_ref[:, :f0_pad] = x_ref[...].astype(act_ref.dtype)

        widx = 0
        for li, (runs, fout_pad) in enumerate(dag_meta):
            acc = None
            for (start_pos, run_len) in runs:
                lo = start_pos * slot_w
                hi = lo + run_len * slot_w
                d = jnp.dot(act_ref[:, lo:hi], w_refs[widx][...],
                            preferred_element_type=jnp.float32)
                acc = d if acc is None else acc + d
                widx += 1
            y = jnp.maximum(acc + b_refs[li][...], 0.0)   # bias + ReLU in f32
            if li == n_layers - 1:
                out_ref[...] = y.astype(out_ref.dtype)
            else:
                base = (li + 1) * slot_w                  # slot of position li+1
                act_ref[:, base:base + fout_pad] = y.astype(act_ref.dtype)

    return kernel


# ---------------------------------------------------------------------------
# One-time parameter preparation: fold mask, split predecessors into maximal
# consecutive runs, stack each run's slabs along Fin, transpose, pad to
# lane-dense multiples of 128, cast to bf16.
# ---------------------------------------------------------------------------
def prepare_fused_params(params, layer_connections, input_width):
    n_layers = len(layer_connections)
    widths = {0: input_width}
    widths_pad = {0: _round_up(input_width, 128)}
    for pos, k in enumerate(layer_connections.keys(), start=1):
        w, _, _ = params[k]
        widths[pos] = int(w.shape[0])
        widths_pad[pos] = _round_up(int(w.shape[0]), 128)

    # Scratch slots for positions 0 .. n_layers-1 (last layer goes straight to
    # the output ref). All slots share one width so consecutive positions are
    # lane-contiguous and can be fed to a single large-K dot.
    n_slots = n_layers
    slot_w = max(widths_pad[p] for p in range(n_slots))
    need_zero = any(widths_pad[p] < slot_w for p in range(n_slots))

    dag_meta = []
    w_slabs = []
    biases = []
    for pos, (k, v) in enumerate(layer_connections.items(), start=1):
        w, m, b = params[k]
        fout = widths[pos]
        fout_pad = widths_pad[pos]
        w_eff = w * m                                   # fold static mask (fwd only)

        # Split the (ordered) predecessor list into maximal consecutive runs.
        runs = []
        col = 0
        cur_pos, cur_cols = None, None
        for v_ in v:
            if cur_pos is not None and v_ == cur_pos[-1] + 1:
                cur_pos.append(v_)
                cur_cols.append(col)
            else:
                if cur_pos is not None:
                    runs.append((cur_pos, cur_cols))
                cur_pos, cur_cols = [v_], [col]
            col += widths[v_]
        if cur_pos is not None:
            runs.append((cur_pos, cur_cols))

        run_meta = []
        for positions, cols in runs:
            run_len = len(positions)
            slab = jnp.zeros((run_len * slot_w, fout_pad), jnp.float32)
            for j, (p, c) in enumerate(zip(positions, cols)):
                win = widths[p]
                block = w_eff[:, c:c + win].T           # (Fin_slab, Fout)
                slab = slab.at[j * slot_w:j * slot_w + win, :fout].set(block)
            w_slabs.append(slab.astype(jnp.bfloat16))
            run_meta.append((positions[0], run_len))

        biases.append(jnp.pad(b, (0, fout_pad - fout))
                      .reshape(1, fout_pad).astype(jnp.float32))
        dag_meta.append((tuple(run_meta), fout_pad))

    return dict(
        dag_meta=dag_meta, widths=widths, widths_pad=widths_pad,
        w_slabs=w_slabs, biases=biases, input_width=input_width,
        n_slots=n_slots, slot_w=slot_w, need_zero_scratch=need_zero,
        f_last=widths[n_layers], f_last_pad=widths_pad[n_layers],
        max_fout_pad=max(widths_pad[p] for p in range(1, n_layers + 1)),
    )


# ---------------------------------------------------------------------------
# Fused forward: one pallas_call for the whole DAG
# ---------------------------------------------------------------------------
def efficient_dagnn_forward(x, fused):
    B, F0 = x.shape
    assert F0 == fused["input_width"]
    f0_pad = fused["widths_pad"][0]
    f_last = fused["f_last"]
    f_last_pad = fused["f_last_pad"]
    dag_meta = fused["dag_meta"]
    w_slabs = fused["w_slabs"]
    biases = fused["biases"]
    n_slots = fused["n_slots"]
    slot_w = fused["slot_w"]
    max_fout_pad = fused["max_fout_pad"]

    # ---- batch tile selection ----
    if B <= 16:
        tb = 16                                  # one bf16 sublane-packed tile
    elif B <= 512:
        tb = _round_up((B + 1) // 2, 16)         # 2 tiles -> both TCs on v7x
    else:
        tb = 256                                 # large-B tile
    # Keep the per-layer f32 accumulator (tb x fout_pad) within ~half the
    # 64-vreg file to avoid spills.
    tb_cap = max(16, ((32 * 1024) // max_fout_pad) // 16 * 16)
    tb = max(16, min(tb, tb_cap))
    b_pad = _round_up(B, tb)
    grid = (b_pad // tb,)

    # Single fused pad (f32); bf16 cast happens inside the kernel.
    x_pad = jnp.pad(x.astype(jnp.float32), ((0, b_pad - B), (0, f0_pad - F0)))

    kernel = _make_dag_kernel(dag_meta, slot_w, f0_pad, tb,
                              fused["need_zero_scratch"])

    # Explicit VMEM budget: in/out double-buffered, weights/biases single.
    vmem_needed = (2 * tb * f0_pad * 4 + 2 * tb * f_last_pad * 4
                   + sum(int(s.size) for s in w_slabs) * 2
                   + sum(int(bb.size) for bb in biases) * 4
                   + tb * n_slots * slot_w * 2)
    vmem_limit = int(min(vmem_needed + (8 << 20), 60 << 20))

    flops = 2 * b_pad * sum(int(s.shape[0]) * int(s.shape[1]) for s in w_slabs)
    bytes_accessed = (int(x_pad.size) * 4
                      + sum(int(s.size) * 2 for s in w_slabs)
                      + sum(int(bb.size) * 4 for bb in biases)
                      + b_pad * f_last_pad * 4)

    def run(single_buffer_consts):
        if single_buffer_consts:
            def const_spec(shape):
                return pl.BlockSpec(shape, lambda i: (0, 0),
                                    pipeline_mode=pl.Buffered(1))
        else:
            def const_spec(shape):
                return pl.BlockSpec(shape, lambda i: (0, 0))

        in_specs = [pl.BlockSpec((tb, f0_pad), lambda i: (i, 0))]
        in_specs += [const_spec(s.shape) for s in w_slabs]
        in_specs += [const_spec(bb.shape) for bb in biases]

        call = pl.pallas_call(
            kernel,
            out_shape=jax.ShapeDtypeStruct((b_pad, f_last_pad), jnp.float32),
            grid=grid,
            in_specs=in_specs,
            out_specs=pl.BlockSpec((tb, f_last_pad), lambda i: (i, 0)),
            scratch_shapes=[pltpu.VMEM((tb, n_slots * slot_w), jnp.bfloat16)],
            compiler_params=pltpu.CompilerParams(
                dimension_semantics=("parallel",),
                vmem_limit_bytes=vmem_limit),
            cost_estimate=pl.CostEstimate(flops=flops, transcendentals=0,
                                          bytes_accessed=bytes_accessed),
        )
        return jax.block_until_ready(call(x_pad, *w_slabs, *biases))

    try:
        out = run(True)
    except Exception:
        # Fallback for environments where pipeline_mode=Buffered(1) on a
        # grid-invariant spec is not supported; identical semantics.
        out = run(False)

    return out[:B, :f_last]


# ---------------------------------------------------------------------------
# Deterministic parameter / mask construction (mirrors MaskedLinear.__init__)
# ---------------------------------------------------------------------------
def build_params(key, layers, layer_connections):
    params = OrderedDict()
    for k, v in layer_connections.items():
        out_features = len(layers[k])
        in_features = sum(len(layers[v_]) for v_ in v)

        key, kw, kb, km = jax.random.split(key, 4)
        bound = 1.0 / math.sqrt(in_features)     # kaiming_uniform_(a=sqrt(5))
        weight = jax.random.uniform(kw, (out_features, in_features),
                                    jnp.float32, -bound, bound)
        bias = jax.random.uniform(kb, (out_features,),
                                  jnp.float32, -bound, bound)

        per_conn = []
        for v_ in v:
            km, kc = jax.random.split(km)
            per_conn.append(
                (jax.random.uniform(kc, (len(layers[v_]), out_features))
                 > 0.3).astype(jnp.float32))
        mask = jnp.concatenate(per_conn, axis=0).T       # (out, in)

        params[k] = (weight, mask, bias)
    return params


# ---------------------------------------------------------------------------
# Pure-JAX references
# ---------------------------------------------------------------------------
def reference_forward(x, params, layer_connections):
    """Exact f32 semantics of the PyTorch module."""
    layer_output = [x]
    for k, v in layer_connections.items():
        inputs = jnp.concatenate([layer_output[v_] for v_ in v], axis=1)
        w, m, b = params[k]
        y = inputs @ (w * m).T + b
        layer_output.append(jnp.maximum(y, 0.0))
    return layer_output[-1]


def reference_forward_bf16(x, params, layer_connections):
    """Emulates the kernel's bf16 MXU inputs with f32 accumulation."""
    layer_output = [x]
    for k, v in layer_connections.items():
        inputs = jnp.concatenate([layer_output[v_] for v_ in v], axis=1)
        w, m, b = params[k]
        w_eff = (w * m).astype(jnp.bfloat16).astype(jnp.float32)
        xin = inputs.astype(jnp.bfloat16).astype(jnp.float32)
        y = xin @ w_eff.T + b
        layer_output.append(jnp.maximum(y, 0.0))
    return layer_output[-1]


if __name__ == "__main__":
    # Small synthetic DAG:
    #   layer 0 = input (32 features)
    #   layer 1 <- [0]        (32 units)
    #   layer 2 <- [0, 1]     (32 units)   -> one fused K=256 dot
    #   layer 3 <- [1, 2]     (16 units)   -> one fused K=256 dot, returned
    layers = {0: list(range(32)), 1: list(range(32)),
              2: list(range(32)), 3: list(range(16))}
    layer_connections = OrderedDict([(1, [0]), (2, [0, 1]), (3, [1, 2])])

    key = jax.random.PRNGKey(0)
    key, kx = jax.random.split(key)
    x = jax.random.normal(kx, (8, len(layers[0])), jnp.float32)

    params = build_params(key, layers, layer_connections)
    fused = prepare_fused_params(params, layer_connections,
                                 input_width=len(layers[0]))

    out = efficient_dagnn_forward(x, fused)
    out = jax.block_until_ready(out)
    assert out.shape == (8, 16)

    # Tight check vs. a bf16-input / f32-accumulate emulation of the kernel.
    ref_bf16 = reference_forward_bf16(x, params, layer_connections)
    assert jnp.allclose(out, ref_bf16, atol=5e-3, rtol=5e-3), \
        "mismatch vs bf16-emulated reference"

    # Loose check vs. the exact f32 PyTorch-equivalent semantics
    # (bf16 MXU inputs -> loosened tolerance).
    ref_f32 = reference_forward(x, params, layer_connections)
    assert jnp.allclose(out, ref_f32, atol=1e-1, rtol=1e-1), \
        "mismatch vs f32 reference"

    print("KERNEL_OK")
</pallas_src>

<mosaic_0001>
module attributes {stable_mosaic.version = 11 : i64} {
  func.func @kernel(%arg0: i32, %arg1: memref<16x128xf32, #tpu.memory_space<vmem>>, %arg2: memref<128x128xbf16, #tpu.memory_space<vmem>>, %arg3: memref<256x128xbf16, #tpu.memory_space<vmem>>, %arg4: memref<256x128xbf16, #tpu.memory_space<vmem>>, %arg5: memref<1x128xf32, #tpu.memory_space<vmem>>, %arg6: memref<1x128xf32, #tpu.memory_space<vmem>>, %arg7: memref<1x128xf32, #tpu.memory_space<vmem>>, %arg8: memref<16x128xf32, #tpu.memory_space<vmem>>, %arg9: memref<16x384xbf16, #tpu.memory_space<vmem>>) attributes {dimension_semantics = [#tpu.dimension_semantics<parallel>], iteration_bounds = array<i64: 1>, scalar_prefetch = 0 : i64, scratch_operands = 1 : i64, tpu.core_type = #tpu.core_type<tc>, window_params = [{transform_indices = @transform_0, window_bounds = array<i64: 16, 128>}, {pipeline_mode = #tpu.pipeline_mode<synchronous>, transform_indices = @transform_1, window_bounds = array<i64: 128, 128>}, {pipeline_mode = #tpu.pipeline_mode<synchronous>, transform_indices = @transform_2, window_bounds = array<i64: 256, 128>}, {pipeline_mode = #tpu.pipeline_mode<synchronous>, transform_indices = @transform_3, window_bounds = array<i64: 256, 128>}, {pipeline_mode = #tpu.pipeline_mode<synchronous>, transform_indices = @transform_4, window_bounds = array<i64: 1, 128>}, {pipeline_mode = #tpu.pipeline_mode<synchronous>, transform_indices = @transform_5, window_bounds = array<i64: 1, 128>}, {pipeline_mode = #tpu.pipeline_mode<synchronous>, transform_indices = @transform_6, window_bounds = array<i64: 1, 128>}, {transform_indices = @transform_7, window_bounds = array<i64: 16, 128>}]} {
    %c0 = arith.constant 0 : index
    %c0_0 = arith.constant 0 : index
    %0 = vector.load %arg1[%c0, %c0_0] : memref<16x128xf32, #tpu.memory_space<vmem>>, vector<16x128xf32>
    %1 = arith.truncf %0 : vector<16x128xf32> to vector<16x128xbf16>
    %c0_1 = arith.constant 0 : index
    %c0_2 = arith.constant 0 : index
    %2 = vector.load %arg9[%c0_1, %c0_2] : memref<16x384xbf16, #tpu.memory_space<vmem>>, vector<16x128xbf16>
    tpu.vector_store %arg9[%c0_1, %c0_2], %1 {strides = array<i32>} : memref<16x384xbf16, #tpu.memory_space<vmem>>, vector<16x128xbf16>,
    %c0_3 = arith.constant 0 : index
    %c0_4 = arith.constant 0 : index
    %3 = vector.load %arg9[%c0_3, %c0_4] : memref<16x384xbf16, #tpu.memory_space<vmem>>, vector<16x128xbf16>
    %c0_5 = arith.constant 0 : index
    %c0_6 = arith.constant 0 : index
    %4 = vector.load %arg2[%c0_5, %c0_6] : memref<128x128xbf16, #tpu.memory_space<vmem>>, vector<128x128xbf16>
    %cst = arith.constant dense<0.000000e+00> : vector<16x128xf32>
    %5 = tpu.matmul %3, %4, %cst {dimension_numbers = #tpu.dot_dimension_numbers<[1], [0], [0], [1], [0, 0, 1, 1], [], []>} : vector<16x128xbf16>, vector<128x128xbf16>, vector<16x128xf32> -> vector<16x128xf32>
    %c0_7 = arith.constant 0 : index
    %c0_8 = arith.constant 0 : index
    %6 = vector.load %arg5[%c0_7, %c0_8] : memref<1x128xf32, #tpu.memory_space<vmem>>, vector<1x128xf32>
    %7 = vector.broadcast %6 : vector<1x128xf32> to vector<16x128xf32>
    %8 = arith.addf %5, %7 : vector<16x128xf32>
    %cst_9 = arith.constant 0.000000e+00 : f32
    %9 = vector.broadcast %cst_9 : f32 to vector<16x128xf32>
    %10 = arith.maximumf %8, %9 : vector<16x128xf32>
    %11 = arith.truncf %10 : vector<16x128xf32> to vector<16x128xbf16>
    %c0_10 = arith.constant 0 : index
    %c128 = arith.constant 128 : index
    %12 = vector.load %arg9[%c0_10, %c128] : memref<16x384xbf16, #tpu.memory_space<vmem>>, vector<16x128xbf16>
    tpu.vector_store %arg9[%c0_10, %c128], %11 {strides = array<i32>} : memref<16x384xbf16, #tpu.memory_space<vmem>>, vector<16x128xbf16>,
    %c0_11 = arith.constant 0 : index
    %c0_12 = arith.constant 0 : index
    %13 = vector.load %arg9[%c0_11, %c0_12] : memref<16x384xbf16, #tpu.memory_space<vmem>>, vector<16x256xbf16>
    %c0_13 = arith.constant 0 : index
    %c0_14 = arith.constant 0 : index
    %14 = vector.load %arg3[%c0_13, %c0_14] : memref<256x128xbf16, #tpu.memory_space<vmem>>, vector<256x128xbf16>
    %cst_15 = arith.constant dense<0.000000e+00> : vector<16x128xf32>
    %15 = tpu.matmul %13, %14, %cst_15 {dimension_numbers = #tpu.dot_dimension_numbers<[1], [0], [0], [1], [0, 0, 1, 1], [], []>} : vector<16x256xbf16>, vector<256x128xbf16>, vector<16x128xf32> -> vector<16x128xf32>
    %c0_16 = arith.constant 0 : index
    %c0_17 = arith.constant 0 : index
    %16 = vector.load %arg6[%c0_16, %c0_17] : memref<1x128xf32, #tpu.memory_space<vmem>>, vector<1x128xf32>
    %17 = vector.broadcast %16 : vector<1x128xf32> to vector<16x128xf32>
    %18 = arith.addf %15, %17 : vector<16x128xf32>
    %cst_18 = arith.constant 0.000000e+00 : f32
    %19 = vector.broadcast %cst_18 : f32 to vector<16x128xf32>
    %20 = arith.maximumf %18, %19 : vector<16x128xf32>
    %21 = arith.truncf %20 : vector<16x128xf32> to vector<16x128xbf16>
    %c0_19 = arith.constant 0 : index
    %c256 = arith.constant 256 : index
    %22 = vector.load %arg9[%c0_19, %c256] : memref<16x384xbf16, #tpu.memory_space<vmem>>, vector<16x128xbf16>
    tpu.vector_store %arg9[%c0_19, %c256], %21 {strides = array<i32>} : memref<16x384xbf16, #tpu.memory_space<vmem>>, vector<16x128xbf16>,
    %c0_20 = arith.constant 0 : index
    %c128_21 = arith.constant 128 : index
    %23 = vector.load %arg9[%c0_20, %c128_21] : memref<16x384xbf16, #tpu.memory_space<vmem>>, vector<16x256xbf16>
    %c0_22 = arith.constant 0 : index
    %c0_23 = arith.constant 0 : index
    %24 = vector.load %arg4[%c0_22, %c0_23] : memref<256x128xbf16, #tpu.memory_space<vmem>>, vector<256x128xbf16>
    %cst_24 = arith.constant dense<0.000000e+00> : vector<16x128xf32>
    %25 = tpu.matmul %23, %24, %cst_24 {dimension_numbers = #tpu.dot_dimension_numbers<[1], [0], [0], [1], [0, 0, 1, 1], [], []>} : vector<16x256xbf16>, vector<256x128xbf16>, vector<16x128xf32> -> vector<16x128xf32>
    %c0_25 = arith.constant 0 : index
    %c0_26 = arith.constant 0 : index
    %26 = vector.load %arg7[%c0_25, %c0_26] : memref<1x128xf32, #tpu.memory_space<vmem>>, vector<1x128xf32>
    %27 = vector.broadcast %26 : vector<1x128xf32> to vector<16x128xf32>
    %28 = arith.addf %25, %27 : vector<16x128xf32>
    %cst_27 = arith.constant 0.000000e+00 : f32
    %29 = vector.broadcast %cst_27 : f32 to vector<16x128xf32>
    %30 = arith.maximumf %28, %29 : vector<16x128xf32>
    %c0_28 = arith.constant 0 : index
    %c0_29 = arith.constant 0 : index
    %31 = vector.load %arg8[%c0_28, %c0_29] : memref<16x128xf32, #tpu.memory_space<vmem>>, vector<16x128xf32>
    tpu.vector_store %arg8[%c0_28, %c0_29], %30 {strides = array<i32>} : memref<16x128xf32, #tpu.memory_space<vmem>>, vector<16x128xf32>,
    return
  }
  func.func @transform_0(%arg0: i32) -> (i32, i32) {
    %c0_i32 = arith.constant 0 : i32
    %c0_i32_0 = arith.constant 0 : i32
    return %arg0, %c0_i32 : i32, i32
  }
  func.func @transform_1(%arg0: i32) -> (i32, i32) {
    %c0_i32 = arith.constant 0 : i32
    %c0_i32_0 = arith.constant 0 : i32
    %c0_i32_1 = arith.constant 0 : i32
    return %c0_i32, %c0_i32_0 : i32, i32
  }
  func.func @transform_2(%arg0: i32) -> (i32, i32) {
    %c0_i32 = arith.constant 0 : i32
    %c0_i32_0 = arith.constant 0 : i32
    %c0_i32_1 = arith.constant 0 : i32
    return %c0_i32, %c0_i32_0 : i32, i32
  }
  func.func @transform_3(%arg0: i32) -> (i32, i32) {
    %c0_i32 = arith.constant 0 : i32
    %c0_i32_0 = arith.constant 0 : i32
    %c0_i32_1 = arith.constant 0 : i32
    return %c0_i32, %c0_i32_0 : i32, i32
  }
  func.func @transform_4(%arg0: i32) -> (i32, i32) {
    %c0_i32 = arith.constant 0 : i32
    %c0_i32_0 = arith.constant 0 : i32
    %c0_i32_1 = arith.constant 0 : i32
    return %c0_i32, %c0_i32_0 : i32, i32
  }
  func.func @transform_5(%arg0: i32) -> (i32, i32) {
    %c0_i32 = arith.constant 0 : i32
    %c0_i32_0 = arith.constant 0 : i32
    %c0_i32_1 = arith.constant 0 : i32
    return %c0_i32, %c0_i32_0 : i32, i32
  }
  func.func @transform_6(%arg0: i32) -> (i32, i32) {
    %c0_i32 = arith.constant 0 : i32
    %c0_i32_0 = arith.constant 0 : i32
    %c0_i32_1 = arith.constant 0 : i32
    return %c0_i32, %c0_i32_0 : i32, i32
  }
  func.func @transform_7(%arg0: i32) -> (i32, i32) {
    %c0_i32 = arith.constant 0 : i32
    %c0_i32_0 = arith.constant 0 : i32
    return %arg0, %c0_i32 : i32, i32
  }
}

module attributes {stable_mosaic.version = 11 : i64} {
  func.func @kernel(%arg0: i32, %arg1: memref<16x128xf32, #tpu.memory_space<vmem>>, %arg2: memref<128x128xbf16, #tpu.memory_space<vmem>>, %arg3: memref<256x128xbf16, #tpu.memory_space<vmem>>, %arg4: memref<256x128xbf16, #tpu.memory_space<vmem>>, %arg5: memref<1x128xf32, #tpu.memory_space<vmem>>, %arg6: memref<1x128xf32, #tpu.memory_space<vmem>>, %arg7: memref<1x128xf32, #tpu.memory_space<vmem>>, %arg8: memref<16x128xf32, #tpu.memory_space<vmem>>, %arg9: memref<16x384xbf16, #tpu.memory_space<vmem>>) attributes {dimension_semantics = [#tpu.dimension_semantics<parallel>], iteration_bounds = array<i64: 1>, scalar_prefetch = 0 : i64, scratch_operands = 1 : i64, tpu.core_type = #tpu.core_type<tc>, window_params = [{transform_indices = @transform_0, window_bounds = array<i64: 16, 128>}, {pipeline_mode = #tpu.pipeline_mode<synchronous>, transform_indices = @transform_1, window_bounds = array<i64: 128, 128>}, {pipeline_mode = #tpu.pipeline_mode<synchronous>, transform_indices = @transform_2, window_bounds = array<i64: 256, 128>}, {pipeline_mode = #tpu.pipeline_mode<synchronous>, transform_indices = @transform_3, window_bounds = array<i64: 256, 128>}, {pipeline_mode = #tpu.pipeline_mode<synchronous>, transform_indices = @transform_4, window_bounds = array<i64: 1, 128>}, {pipeline_mode = #tpu.pipeline_mode<synchronous>, transform_indices = @transform_5, window_bounds = array<i64: 1, 128>}, {pipeline_mode = #tpu.pipeline_mode<synchronous>, transform_indices = @transform_6, window_bounds = array<i64: 1, 128>}, {transform_indices = @transform_7, window_bounds = array<i64: 16, 128>}]} {
    %c0 = arith.constant 0 : index
    %c0_0 = arith.constant 0 : index
    %0 = vector.load %arg1[%c0, %c0_0] : memref<16x128xf32, #tpu.memory_space<vmem>>, vector<16x128xf32>
    %1 = arith.truncf %0 : vector<16x128xf32> to vector<16x128xbf16>
    %c0_1 = arith.constant 0 : index
    %c0_2 = arith.constant 0 : index
    %2 = vector.load %arg9[%c0_1, %c0_2] : memref<16x384xbf16, #tpu.memory_space<vmem>>, vector<16x128xbf16>
    tpu.vector_store %arg9[%c0_1, %c0_2], %1 {strides = array<i32>} : memref<16x384xbf16, #tpu.memory_space<vmem>>, vector<16x128xbf16>,
    %c0_3 = arith.constant 0 : index
    %c0_4 = arith.constant 0 : index
    %3 = vector.load %arg9[%c0_3, %c0_4] : memref<16x384xbf16, #tpu.memory_space<vmem>>, vector<16x128xbf16>
    %c0_5 = arith.constant 0 : index
    %c0_6 = arith.constant 0 : index
    %4 = vector.load %arg2[%c0_5, %c0_6] : memref<128x128xbf16, #tpu.memory_space<vmem>>, vector<128x128xbf16>
    %cst = arith.constant dense<0.000000e+00> : vector<16x128xf32>
    %5 = tpu.matmul %3, %4, %cst {dimension_numbers = #tpu.dot_dimension_numbers<[1], [0], [0], [1], [0, 0, 1, 1], [], []>} : vector<16x128xbf16>, vector<128x128xbf16>, vector<16x128xf32> -> vector<16x128xf32>
    %c0_7 = arith.constant 0 : index
    %c0_8 = arith.constant 0 : index
    %6 = vector.load %arg5[%c0_7, %c0_8] : memref<1x128xf32, #tpu.memory_space<vmem>>, vector<1x128xf32>
    %7 = vector.broadcast %6 : vector<1x128xf32> to vector<16x128xf32>
    %8 = arith.addf %5, %7 : vector<16x128xf32>
    %cst_9 = arith.constant 0.000000e+00 : f32
    %9 = vector.broadcast %cst_9 : f32 to vector<16x128xf32>
    %10 = arith.maximumf %8, %9 : vector<16x128xf32>
    %11 = arith.truncf %10 : vector<16x128xf32> to vector<16x128xbf16>
    %c0_10 = arith.constant 0 : index
    %c128 = arith.constant 128 : index
    %12 = vector.load %arg9[%c0_10, %c128] : memref<16x384xbf16, #tpu.memory_space<vmem>>, vector<16x128xbf16>
    tpu.vector_store %arg9[%c0_10, %c128], %11 {strides = array<i32>} : memref<16x384xbf16, #tpu.memory_space<vmem>>, vector<16x128xbf16>,
    %c0_11 = arith.constant 0 : index
    %c0_12 = arith.constant 0 : index
    %13 = vector.load %arg9[%c0_11, %c0_12] : memref<16x384xbf16, #tpu.memory_space<vmem>>, vector<16x256xbf16>
    %c0_13 = arith.constant 0 : index
    %c0_14 = arith.constant 0 : index
    %14 = vector.load %arg3[%c0_13, %c0_14] : memref<256x128xbf16, #tpu.memory_space<vmem>>, vector<256x128xbf16>
    %cst_15 = arith.constant dense<0.000000e+00> : vector<16x128xf32>
    %15 = tpu.matmul %13, %14, %cst_15 {dimension_numbers = #tpu.dot_dimension_numbers<[1], [0], [0], [1], [0, 0, 1, 1], [], []>} : vector<16x256xbf16>, vector<256x128xbf16>, vector<16x128xf32> -> vector<16x128xf32>
    %c0_16 = arith.constant 0 : index
    %c0_17 = arith.constant 0 : index
    %16 = vector.load %arg6[%c0_16, %c0_17] : memref<1x128xf32, #tpu.memory_space<vmem>>, vector<1x128xf32>
    %17 = vector.broadcast %16 : vector<1x128xf32> to vector<16x128xf32>
    %18 = arith.addf %15, %17 : vector<16x128xf32>
    %cst_18 = arith.constant 0.000000e+00 : f32
    %19 = vector.broadcast %cst_18 : f32 to vector<16x128xf32>
    %20 = arith.maximumf %18, %19 : vector<16x128xf32>
    %21 = arith.truncf %20 : vector<16x128xf32> to vector<16x128xbf16>
    %c0_19 = arith.constant 0 : index
    %c256 = arith.constant 256 : index
    %22 = vector.load %arg9[%c0_19, %c256] : memref<16x384xbf16, #tpu.memory_space<vmem>>, vector<16x128xbf16>
    tpu.vector_store %arg9[%c0_19, %c256], %21 {strides = array<i32>} : memref<16x384xbf16, #tpu.memory_space<vmem>>, vector<16x128xbf16>,
    %c0_20 = arith.constant 0 : index
    %c128_21 = arith.constant 128 : index
    %23 = vector.load %arg9[%c0_20, %c128_21] : memref<16x384xbf16, #tpu.memory_space<vmem>>, vector<16x256xbf16>
    %c0_22 = arith.constant 0 : index
    %c0_23 = arith.constant 0 : index
    %24 = vector.load %arg4[%c0_22, %c0_23] : memref<256x128xbf16, #tpu.memory_space<vmem>>, vector<256x128xbf16>
    %cst_24 = arith.constant dense<0.000000e+00> : vector<16x128xf32>
    %25 = tpu.matmul %23, %24, %cst_24 {dimension_numbers = #tpu.dot_dimension_numbers<[1], [0], [0], [1], [0, 0, 1, 1], [], []>} : vector<16x256xbf16>, vector<256x128xbf16>, vector<16x128xf32> -> vector<16x128xf32>
    %c0_25 = arith.constant 0 : index
    %c0_26 = arith.constant 0 : index
    %26 = vector.load %arg7[%c0_25, %c0_26] : memref<1x128xf32, #tpu.memory_space<vmem>>, vector<1x128xf32>
    %27 = vector.broadcast %26 : vector<1x128xf32> to vector<16x128xf32>
    %28 = arith.addf %25, %27 : vector<16x128xf32>
    %cst_27 = arith.constant 0.000000e+00 : f32
    %29 = vector.broadcast %cst_27 : f32 to vector<16x128xf32>
    %30 = arith.maximumf %28, %29 : vector<16x128xf32>
    %c0_28 = arith.constant 0 : index
    %c0_29 = arith.constant 0 : index
    %31 = vector.load %arg8[%c0_28, %c0_29] : memref<16x128xf32, #tpu.memory_space<vmem>>, vector<16x128xf32>
    tpu.vector_store %arg8[%c0_28, %c0_29], %30 {strides = array<i32>} : memref<16x128xf32, #tpu.memory_space<vmem>>, vector<16x128xf32>,
    return
  }
  func.func @transform_0(%arg0: i32) -> (i32, i32) {
    %c0_i32 = arith.constant 0 : i32
    %c0_i32_0 = arith.constant 0 : i32
    return %arg0, %c0_i32 : i32, i32
  }
  func.func @transform_1(%arg0: i32) -> (i32, i32) {
    %c0_i32 = arith.constant 0 : i32
    %c0_i32_0 = arith.constant 0 : i32
    %c0_i32_1 = arith.constant 0 : i32
    return %c0_i32, %c0_i32_0 : i32, i32
  }
  func.func @transform_2(%arg0: i32) -> (i32, i32) {
    %c0_i32 = arith.constant 0 : i32
    %c0_i32_0 = arith.constant 0 : i32
    %c0_i32_1 = arith.constant 0 : i32
    return %c0_i32, %c0_i32_0 : i32, i32
  }
  func.func @transform_3(%arg0: i32) -> (i32, i32) {
    %c0_i32 = arith.constant 0 : i32
    %c0_i32_0 = arith.constant 0 : i32
    %c0_i32_1 = arith.constant 0 : i32
    return %c0_i32, %c0_i32_0 : i32, i32
  }
  func.func @transform_4(%arg0: i32) -> (i32, i32) {
    %c0_i32 = arith.constant 0 : i32
    %c0_i32_0 = arith.constant 0 : i32
    %c0_i32_1 = arith.constant 0 : i32
    return %c0_i32, %c0_i32_0 : i32, i32
  }
  func.func @transform_5(%arg0: i32) -> (i32, i32) {
    %c0_i32 = arith.constant 0 : i32
    %c0_i32_0 = arith.constant 0 : i32
    %c0_i32_1 = arith.constant 0 : i32
    return %c0_i32, %c0_i32_0 : i32, i32
  }
  func.func @transform_6(%arg0: i32) -> (i32, i32) {
    %c0_i32 = arith.constant 0 : i32
    %c0_i32_0 = arith.constant 0 : i32
    %c0_i32_1 = arith.constant 0 : i32
    return %c0_i32, %c0_i32_0 : i32, i32
  }
  func.func @transform_7(%arg0: i32) -> (i32, i32) {
    %c0_i32 = arith.constant 0 : i32
    %c0_i32_0 = arith.constant 0 : i32
    return %arg0, %c0_i32 : i32, i32
  }
}

</mosaic_0001>

<bundles_post_ra>
// kernel: tpu_custom_call.1
= control target key start
LH: loop header
LB: loop body
LE: loop exit
PB: predicated region body
PF: predicated region fallthrough
CT: control target
= control target key end

     0   :  { %12 = vsyncpa [#allocation4], 0  ;;  %s1014_s0 = inlined_call_operand.hbm [shape: f32[16,128], index: 0, kind: input, shape index: {}]   ;;  %s1015_s1 = inlined_call_operand.hbm [shape: bf16[128,128], index: 1, kind: input, shape index: {}]   ;;  %s1016_s2 = inlined_call_operand.hbm [shape: bf16[256,128], index: 2, kind: input, shape index: {}]   ;;  %s1017_s3 = inlined_call_operand.hbm [shape: bf16[256,128], index: 3, kind: input, shape index: {}]   ;;  %s1018_s4 = inlined_call_operand.vmem [shape: f32[1,128], index: 4, kind: input, shape index: {}]   ;;  %s1019_s5 = inlined_call_operand.vmem [shape: f32[1,128], index: 5, kind: input, shape index: {}]   ;;  %s1020_s6 = inlined_call_operand.vmem [shape: f32[1,128], index: 6, kind: input, shape index: {}]   ;;  %s1021_s7 = inlined_call_operand.hbm [shape: f32[16,128], index: 7, kind: output, shape index: {}]  }
   0x1   :  { %13 = vsyncpa [#allocation7], 0 }
   0x2   :  { %14 = vsyncpa [#allocation10], 0 }
   0x3   :  { %15 = vsyncpa [#allocation5], 0  ;;  %s872_s24 = smov [#allocation6]   ;;  %s754_s28 = scalar_lea.hbm %s1015_s1, 1024 }
   0x4   :  { %s33_s25 = sshll.u32 %s872_s24, 4  ;;  %p755_p0 = scmp.ne.s32.totalorder %s1015_s1, %s754_s28  ;;  %s34_s25 = int_to_ptr.vmem [resolvable:$true] %s33_s25 }
   0x5   :  { %p758_p1 = scmp.lt.u32.totalorder %s754_s28, %s1015_s1 }
   0x7   :  { %p760_p2 = pnand %p758_p1, %p755_p0 }
   0x9   :  { %763 = shalt.err (!%p760_p2)
}
   0xa   :  { %s764_s10 = scalar_lea.vmem %s34_s25, 1024  ;;  %p769_p4 = scmp.lt.s32.totalorder %s34_s25, %s34_s25 }
   0xb   :  { %p765_p3 = scmp.ne.s32.totalorder %s34_s25, %s764_s10  ;;  %p770_p5 = scmp.lt.s32.totalorder %s764_s10, %s764_s10 }
   0xd   :  { %p771_p6 = por %p770_p5, %p769_p4 }
   0xf   :  { %p772_p7 = pnand %p771_p6, %p765_p3 }
  0x11   :  { %775 = shalt.err (!%p772_p7)
}
  0x12   :  { %s873_s11 = smov 64   ;;  %s874_s12 = smov 4  }
  0x13   :  { %39 = dma.hbm_to_vmem [thread:$0]  %s1015_s1, 1024, %s34_s25, [#allocation7], %s873_s11, %s873_s11, %s874_s12  }
  0x14   :  { %s875_s15 = smov [#allocation3]   ;;  %s776_s19 = scalar_lea.hbm %s1014_s0, 256 }
  0x15   :  { %s21_s16 = sshll.u32 %s875_s15, 4  ;;  %p777_p8 = scmp.ne.s32.totalorder %s1014_s0, %s776_s19  ;;  %s22_s16 = int_to_ptr.vmem [resolvable:$true] %s21_s16 }
  0x16   :  { %p780_p9 = scmp.lt.u32.totalorder %s776_s19, %s1014_s0 }
  0x18   :  { %p782_p10 = pnand %p780_p9, %p777_p8 }
  0x1a   :  { %785 = shalt.err (!%p782_p10)
}
  0x1b   :  { %s786_s24 = scalar_lea.vmem %s22_s16, 256  ;;  %p791_p12 = scmp.lt.s32.totalorder %s22_s16, %s22_s16 }
  0x1c   :  { %p787_p11 = scmp.ne.s32.totalorder %s22_s16, %s786_s24  ;;  %p792_p13 = scmp.lt.s32.totalorder %s786_s24, %s786_s24 }
  0x1e   :  { %p793_p0 = por %p792_p13, %p791_p12 }
  0x20   :  { %p794_p1 = pnand %p793_p0, %p787_p11 }
  0x22   :  { %797 = shalt.err (!%p794_p1)
}
  0x23   :  { %s876_s1 = smov 128   ;;  %s877_s25 = smov 8  }
  0x24   :  { %27 = dma.hbm_to_vmem [thread:$0]  %s1014_s0, 256, %s22_s16, [#allocation4], %s876_s1, %s876_s1, %s877_s25  }
  0x25   :  { %s878_s28 = smov [#allocation8]   ;;  %s879_s30 = smov [#allocation9]  }
  0x26   :  { %s45_s29 = sshll.u32 %s878_s28, 4  ;;  %s57_s8 = sshll.u32 %s879_s30, 4  ;;  %s46_s29 = int_to_ptr.vmem [resolvable:$true] %s45_s29  ;;  %s953_s8 = int_to_ptr.vmem [resolvable:$true] %s57_s8 }
  0x27   :  { %s798_s13 = scalar_lea.hbm %s1016_s2, 2048 }
  0x28   :  { %p799_p2 = scmp.ne.s32.totalorder %s1016_s2, %s798_s13  ;;  %p802_p3 = scmp.lt.u32.totalorder %s798_s13, %s1016_s2 }
  0x2a   :  { %p804_p4 = pnand %p802_p3, %p799_p2 }
  0x2c   :  { %807 = shalt.err (!%p804_p4)
}
  0x2d   :  { %s808_s0 = scalar_lea.vmem %s46_s29, 2048  ;;  %p813_p6 = scmp.lt.s32.totalorder %s46_s29, %s46_s29 }
  0x2e   :  { %p809_p5 = scmp.ne.s32.totalorder %s46_s29, %s808_s0  ;;  %p814_p7 = scmp.lt.s32.totalorder %s808_s0, %s808_s0 }
  0x30   :  { %p815_p8 = por %p814_p7, %p813_p6 }
  0x32   :  { %p816_p9 = pnand %p815_p8, %p809_p5 }
  0x34   :  { %819 = shalt.err (!%p816_p9)
}
  0x35   :  { %51 = dma.hbm_to_vmem [thread:$0]  %s1016_s2, 2048, %s46_s29, [#allocation7], %s873_s11, %s873_s11, %s874_s12  }
  0x36   :  { %s820_s22 = scalar_lea.hbm %s1017_s3, 2048 }
  0x37   :  { %p821_p10 = scmp.ne.s32.totalorder %s1017_s3, %s820_s22  ;;  %p824_p11 = scmp.lt.u32.totalorder %s820_s22, %s1017_s3 }
  0x39   :  { %p826_p12 = pnand %p824_p11, %p821_p10 }
  0x3b   :  { %829 = shalt.err (!%p826_p12)
}
  0x3c   :  { %s830_s28 = scalar_lea.vmem %s953_s8, 2048  ;;  %p835_p0 = scmp.lt.s32.totalorder %s953_s8, %s953_s8 }
  0x3d   :  { %p831_p13 = scmp.ne.s32.totalorder %s953_s8, %s830_s28  ;;  %p836_p1 = scmp.lt.s32.totalorder %s830_s28, %s830_s28 }
  0x3f   :  { %p837_p2 = por %p836_p1, %p835_p0 }
  0x41   :  { %p838_p3 = pnand %p837_p2, %p831_p13 }
  0x43   :  { %841 = shalt.err (!%p838_p3)
}
  0x44   :  { %63 = dma.hbm_to_vmem [thread:$0]  %s1017_s3, 2048, %s953_s8, [#allocation10], %s873_s11, %s873_s11, %s874_s12  }
  0x45   :  { %864 = dma.done.wait [#allocation4], 256  }
  0x46   :  { %865 = vsyncadd [#allocation4], 4294967040 }
  0x47   :  { %866 = dma.done.wait [#allocation7], 3072  }
  0x48   :  { %867 = vsyncadd [#allocation7], 4294964224 }
  0x49   :  { %868 = dma.done.wait [#allocation10], 2048  }
  0x4a   :  { %869 = vsyncadd [#allocation10], 4294965248  ;;  %v880_v0 = vmov 0.0   ;;  %vm881_vm0 = vmmov 0   ;;  %v714_v1 = vld [vmem:[#allocation6] sm:$0xff]   ;;  %v715_v2 = vld [vmem:[#allocation6 + $0x8] sm:$0xff]  }
  0x4b   :  { %683 = vmatprep.subr.bf16.mxu0 %v880_v0  ;;  %699 = vmatprep.mubr.msk.bf16.mxu0 %vm881_vm0, %v880_v0  ;;  %v716_v3 = vld [vmem:[#allocation6 + $0x10] sm:$0xff]   ;;  %v717_v4 = vld [vmem:[#allocation6 + $0x18] sm:$0xff]   ;;  %v722_v5 = vld [vmem:[#allocation8 + $0x40] sm:$0xff]  }
  0x4c   :  { %684 = vmatpush3.bf16.msra.mxu0 %v714_v1  ;;  %v723_v6 = vld [vmem:[#allocation8] sm:$0xff]   ;;  %639 = vmatprep.subr.bf16.mxu1 %v722_v5  ;;  %v724_v7 = vld [vmem:[#allocation8 + $0x48] sm:$0xff]   ;;  %v726_v9 = vld [vmem:[#allocation8 + $0x50] sm:$0xff]  }
  0x4d   :  { %685 = vmatprep.subr.bf16.mxu0 %v880_v0  ;;  %640 = vmatpush3.bf16.msra.mxu1 %v723_v6  ;;  %v725_v8 = vld [vmem:[#allocation8 + $0x8] sm:$0xff]   ;;  %v718_v10 = vld [vmem:[#allocation6 + $0x20] sm:$0xff]   ;;  %v727_v11 = vld [vmem:[#allocation8 + $0x10] sm:$0xff]  }
  0x4e   :  { %641 = vmatprep.subr.bf16.mxu1 %v724_v7  ;;  %v728_v12 = vld [vmem:[#allocation8 + $0x58] sm:$0xff]   ;;  %v719_v13 = vld [vmem:[#allocation6 + $0x28] sm:$0xff]   ;;  %v720_v14 = vld [vmem:[#allocation6 + $0x30] sm:$0xff]  }
  0x4f   :  { %v729_v15 = vld [vmem:[#allocation8 + $0x18] sm:$0xff]   ;;  %v730_v16 = vld [vmem:[#allocation8 + $0x60] sm:$0xff]   ;;  %v732_v18 = vld [vmem:[#allocation8 + $0x68] sm:$0xff]  }
  0x50   :  { %686 = vmatpush3.bf16.msra.mxu0 %v715_v2  ;;  %v731_v17 = vld [vmem:[#allocation8 + $0x20] sm:$0xff]   ;;  %v721_v19 = vld [vmem:[#allocation6 + $0x38] sm:$0xff]   ;;  %v83_v20 = vld [vmem:[#allocation3] sm:$0xff] }
  0x51   :  { %687 = vmatprep.subr.bf16.mxu0 %v880_v0  ;;  %642 = vmatpush3.bf16.msra.mxu1 %v725_v8  ;;  %v84_v21 = vld [vmem:[#allocation3 + $0x8] sm:$0xff]  ;;  %v733_v22 = vld [vmem:[#allocation8 + $0x28] sm:$0xff]   ;;  %v734_v24 = vld [vmem:[#allocation8 + $0x70] sm:$0xff]  }
  0x52   :  { %643 = vmatprep.subr.bf16.mxu1 %v726_v9  ;;  %v85_v23 = vpack.c.bf16 %v84_v21, %v83_v20  ;;  %v735_v25 = vld [vmem:[#allocation8 + $0x30] sm:$0xff]   ;;  %v736_v26 = vld [vmem:[#allocation8 + $0x78] sm:$0xff]   ;;  %v738_v28 = vld [vmem:[#allocation9 + $0x40] sm:$0xff]  }
  0x53   :  { %v737_v27 = vld [vmem:[#allocation8 + $0x38] sm:$0xff]   ;;  %v739_v29 = vld [vmem:[#allocation9] sm:$0xff]   ;;  %v740_v30 = vld [vmem:[#allocation9 + $0x48] sm:$0xff]  }
  0x54   :  { %688 = vmatpush3.bf16.msra.mxu0 %v716_v3  ;;  %v741_v31 = vld [vmem:[#allocation9 + $0x8] sm:$0xff]   ;;  %v742_v32 = vld [vmem:[#allocation9 + $0x50] sm:$0xff]   ;;  %v744_v34 = vld [vmem:[#allocation9 + $0x58] sm:$0xff]  }
  0x55   :  { %689 = vmatprep.subr.bf16.mxu0 %v880_v0  ;;  %644 = vmatpush3.bf16.msra.mxu1 %v727_v11  ;;  %v743_v33 = vld [vmem:[#allocation9 + $0x10] sm:$0xff]   ;;  %v745_v35 = vld [vmem:[#allocation9 + $0x18] sm:$0xff]   ;;  %v746_v36 = vld [vmem:[#allocation9 + $0x60] sm:$0xff]  }
  0x56   :  { %645 = vmatprep.subr.bf16.mxu1 %v728_v12  ;;  %v747_v37 = vld [vmem:[#allocation9 + $0x20] sm:$0xff]   ;;  %v587_v38 = vld [vmem:[%s1018_s4] ss:$0 sm:$0xff]  ;;  %v748_v48 = vld [vmem:[#allocation9 + $0x68] sm:$0xff]  }
  0x57   :  { %v749_v49 = vld [vmem:[#allocation9 + $0x28] sm:$0xff]   ;;  %v750_v50 = vld [vmem:[#allocation9 + $0x70] sm:$0xff]   ;;  %v752_v52 = vld [vmem:[#allocation9 + $0x78] sm:$0xff]  }
  0x58   :  { %690 = vmatpush3.bf16.msra.mxu0 %v717_v4  ;;  %v751_v51 = vld [vmem:[#allocation9 + $0x30] sm:$0xff]   ;;  %v753_v53 = vld [vmem:[#allocation9 + $0x38] sm:$0xff]  }
  0x59   :  { %691 = vmatprep.subr.bf16.mxu0 %v880_v0  ;;  %646 = vmatpush3.bf16.msra.mxu1 %v729_v15  ;;  %v596_v55 = vld [vmem:[%s1019_s5] ss:$0 sm:$0xff]  ;;  %s882_s5 = smov [#allocation11]  }
  0x5a   :  { %647 = vmatprep.subr.bf16.mxu1 %v730_v16  ;;  %v613_v3 = vld [vmem:[%s1020_s6] ss:$0 sm:$0xff]  ;;  %s573_s9 = sshll.u32 %s882_s5, 4  ;;  %s574_s9 = int_to_ptr.vmem [resolvable:$true] %s573_s9 }
  0x5b   :  { %s842_s10 = scalar_lea.vmem %s574_s9, 256  ;;  %p847_p5 = scmp.lt.s32.totalorder %s574_s9, %s574_s9 }
  0x5c   :  { %692 = vmatpush3.bf16.msra.mxu0 %v718_v10  ;;  %p843_p4 = scmp.ne.s32.totalorder %s574_s9, %s842_s10  ;;  %p848_p6 = scmp.lt.s32.totalorder %s842_s10, %s842_s10 }
  0x5d   :  { %693 = vmatprep.subr.bf16.mxu0 %v880_v0  ;;  %648 = vmatpush3.bf16.msra.mxu1 %v731_v17 }
  0x5e   :  { %649 = vmatprep.subr.bf16.mxu1 %v732_v18  ;;  %p849_p7 = por %p848_p6, %p847_p5 }
  0x60   :  { %694 = vmatpush3.bf16.msra.mxu0 %v719_v13  ;;  %p850_p8 = pnand %p849_p7, %p843_p4 }
  0x61   :  { %695 = vmatprep.subr.bf16.mxu0 %v880_v0  ;;  %650 = vmatpush3.bf16.msra.mxu1 %v733_v22 }
  0x62   :  { %651 = vmatprep.subr.bf16.mxu1 %v734_v24 }
  0x64   :  { %696 = vmatpush3.bf16.msra.mxu0 %v720_v14 }
  0x65   :  { %697 = vmatprep.subr.bf16.mxu0 %v880_v0  ;;  %652 = vmatpush3.bf16.msra.mxu1 %v735_v25 }
  0x66   :  { %653 = vmatprep.subr.bf16.mxu1 %v736_v26 }
  0x68   :  { %698 = vmatpush3.bf16.msra.mxu0 %v721_v19 }
  0x69   :  { %654 = vmatpush3.bf16.msra.mxu1 %v737_v27  ;;  %661 = vmatprep.subr.bf16.mxu0 %v738_v28 }
  0x6b   :  { %700 = vmatmul.mubr.bf16.vlgmr.msra.gmra.mrb[0].mxu0 %v85_v23 }
  0x6c   :  { %662 = vmatpush3.bf16.msra.mxu0 %v739_v29 }
  0x6d   :  { %663 = vmatprep.subr.bf16.mxu0 %v740_v30 }
  0x70   :  { %664 = vmatpush3.bf16.msra.mxu0 %v741_v31 }
  0x71   :  { %665 = vmatprep.subr.bf16.mxu0 %v742_v32 }
  0x74   :  { %666 = vmatpush3.bf16.msra.mxu0 %v743_v33 }
  0x75   :  { %667 = vmatprep.subr.bf16.mxu0 %v744_v34 }
  0x78   :  { %668 = vmatpush3.bf16.msra.mxu0 %v745_v35 }
  0x79   :  { %669 = vmatprep.subr.bf16.mxu0 %v746_v36 }
  0x7c   :  { %670 = vmatpush3.bf16.msra.mxu0 %v747_v37 }
  0x7d   :  { %671 = vmatprep.subr.bf16.mxu0 %v748_v48 }
  0x80   :  { %672 = vmatpush3.bf16.msra.mxu0 %v749_v49 }
  0x81   :  { %673 = vmatprep.subr.bf16.mxu0 %v750_v50 }
  0x84   :  { %674 = vmatpush3.bf16.msra.mxu0 %v751_v51 }
  0x85   :  { %675 = vmatprep.subr.bf16.mxu0 %v752_v52 }
  0x88   :  { %676 = vmatpush3.bf16.msra.mxu0 %v753_v53 }
 0x13e   :  { %v193_v39 = vpop.f32.mrb[0].mxu0 }
 0x13f   :  { %v194_v40 = vadd.f32 %v587_v38, %v193_v39  ;;  %v701_v41 = vpop.f32.mrb[1].mxu0 }
 0x140   :  { %v196_v42 = vpop.f32.mrb[2].mxu0 }
 0x141   :  { %v197_v43 = vadd.f32 %v587_v38, %v196_v42  ;;  %v702_v44 = vpop.f32.mrb[3].mxu0  ;;  %v200_v45 = vmax.f32 %v194_v40, 0.0 }
 0x143   :  { %v201_v46 = vmax.f32 %v197_v43, 0.0 }
 0x145   :  { %v202_v47 = vpack.c.bf16 %v201_v46, %v200_v45 }
 0x147   :  { %373 = vmatprep.mubr.bf16.mxu1 %v202_v47 }
 0x148   :  { %374 = vmatmul.mubr.bf16.vlgmr.msra.gmra.mrb[0].mxu1 %v85_v23 }
 0x21b   :  { %v655_v54 = vpop.f32.mrb[0].mxu1 }
 0x21c   :  { %v656_v56 = vpop.f32.mrb[1].mxu1 }
 0x21d   :  { %v657_v57 = vadd.f32 %v656_v56, %v655_v54  ;;  %v658_v58 = vpop.f32.mrb[2].mxu1 }
 0x21e   :  { %v659_v59 = vpop.f32.mrb[3].mxu1 }
 0x21f   :  { %v376_v60 = vadd.f32 %v657_v57, %v596_v55  ;;  %v660_v61 = vadd.f32 %v659_v59, %v658_v58 }
 0x221   :  { %v379_v62 = vadd.f32 %v660_v61, %v596_v55  ;;  %v382_v63 = vmax.f32 %v376_v60, 0.0 }
 0x223   :  { %v383_v0 = vmax.f32 %v379_v62, 0.0 }
 0x225   :  { %v384_v1 = vpack.c.bf16 %v383_v0, %v382_v63 }
 0x227   :  { %555 = vmatprep.mubr.bf16.mxu0 %v384_v1 }
 0x228   :  { %556 = vmatmul.mubr.bf16.vlgmr.msra.gmra.mrb[4].mxu0 %v202_v47 }
 0x2fb   :  { %v677_v2 = vpop.f32.mrb[4].mxu0 }
 0x2fc   :  { %v678_v4 = vpop.f32.mrb[5].mxu0 }
 0x2fd   :  { %v679_v5 = vadd.f32 %v678_v4, %v677_v2  ;;  %v680_v6 = vpop.f32.mrb[6].mxu0 }
 0x2fe   :  { %v681_v7 = vpop.f32.mrb[7].mxu0 }
 0x2ff   :  { %v558_v8 = vadd.f32 %v679_v5, %v613_v3  ;;  %v682_v9 = vadd.f32 %v681_v7, %v680_v6 }
 0x301   :  { %v564_v10 = vmax.f32 %v558_v8, 0.0  ;;  %v561_v11 = vadd.f32 %v682_v9, %v613_v3 }
 0x303   :  { %566 = vst [vmem:[#allocation11] sm:$0xff] %v564_v10  ;;  %v565_v12 = vmax.f32 %v561_v11, 0.0 }
 0x305   :  { %567 = vst [vmem:[#allocation11 + $0x8] sm:$0xff] %v565_v12 }
 0x306   :  { %853 = shalt.err (!%p850_p8)
}
 0x307   :  { %s854_s14 = scalar_lea.hbm %s1021_s7, 256 }
 0x308   :  { %p855_p9 = scmp.ne.s32.totalorder %s1021_s7, %s854_s14  ;;  %p858_p10 = scmp.lt.u32.totalorder %s854_s14, %s1021_s7 }
 0x30a   :  { %p860_p11 = pnand %p858_p10, %p855_p9 }
 0x30c   :  { %863 = shalt.err (!%p860_p11)
}
 0x30d   :  { %579 = dma.vmem_to_hbm [thread:$0]  %s574_s9, 256, %s1021_s7, [#allocation5], %s876_s1, %s876_s1, %s877_s25  }
 0x30e   :  { %870 = dma.done.wait [#allocation5], 256  }
 0x30f   :  { %871 = vsyncadd [#allocation5], 4294967040 }
 0x310   :  { %583 = vsyncpa [#allocation4], 1 }
 0x311   :  { %584 = vsyncpa [#allocation7], 1 }
 0x312   :  { %585 = vsyncpa [#allocation10], 1 }
 0x313   :  { %586 = vsyncpa [#allocation5], 1 }

// kernel: tpu_custom_call.1
= control target key start
LH: loop header
LB: loop body
LE: loop exit
PB: predicated region body
PF: predicated region fallthrough
CT: control target
= control target key end

     0   :  { %12 = vsyncpa [#allocation4], 0  ;;  %s1014_s0 = inlined_call_operand.hbm [shape: f32[16,128], index: 0, kind: input, shape index: {}]   ;;  %s1015_s1 = inlined_call_operand.hbm [shape: bf16[128,128], index: 1, kind: input, shape index: {}]   ;;  %s1016_s2 = inlined_call_operand.hbm [shape: bf16[256,128], index: 2, kind: input, shape index: {}]   ;;  %s1017_s3 = inlined_call_operand.hbm [shape: bf16[256,128], index: 3, kind: input, shape index: {}]   ;;  %s1018_s4 = inlined_call_operand.vmem [shape: f32[1,128], index: 4, kind: input, shape index: {}]   ;;  %s1019_s5 = inlined_call_operand.vmem [shape: f32[1,128], index: 5, kind: input, shape index: {}]   ;;  %s1020_s6 = inlined_call_operand.vmem [shape: f32[1,128], index: 6, kind: input, shape index: {}]   ;;  %s1021_s7 = inlined_call_operand.hbm [shape: f32[16,128], index: 7, kind: output, shape index: {}]  }
   0x1   :  { %13 = vsyncpa [#allocation7], 0 }
   0x2   :  { %14 = vsyncpa [#allocation10], 0 }
   0x3   :  { %15 = vsyncpa [#allocation5], 0  ;;  %s872_s24 = smov [#allocation6]   ;;  %s754_s28 = scalar_lea.hbm %s1015_s1, 1024 }
   0x4   :  { %s33_s25 = sshll.u32 %s872_s24, 4  ;;  %p755_p0 = scmp.ne.s32.totalorder %s1015_s1, %s754_s28  ;;  %s34_s25 = int_to_ptr.vmem [resolvable:$true] %s33_s25 }
   0x5   :  { %p758_p1 = scmp.lt.u32.totalorder %s754_s28, %s1015_s1 }
   0x7   :  { %p760_p2 = pnand %p758_p1, %p755_p0 }
   0x9   :  { %763 = shalt.err (!%p760_p2)
}
   0xa   :  { %s764_s10 = scalar_lea.vmem %s34_s25, 1024  ;;  %p769_p4 = scmp.lt.s32.totalorder %s34_s25, %s34_s25 }
   0xb   :  { %p765_p3 = scmp.ne.s32.totalorder %s34_s25, %s764_s10  ;;  %p770_p5 = scmp.lt.s32.totalorder %s764_s10, %s764_s10 }
   0xd   :  { %p771_p6 = por %p770_p5, %p769_p4 }
   0xf   :  { %p772_p7 = pnand %p771_p6, %p765_p3 }
  0x11   :  { %775 = shalt.err (!%p772_p7)
}
  0x12   :  { %s873_s11 = smov 64   ;;  %s874_s12 = smov 4  }
  0x13   :  { %39 = dma.hbm_to_vmem [thread:$0]  %s1015_s1, 1024, %s34_s25, [#allocation7], %s873_s11, %s873_s11, %s874_s12  }
  0x14   :  { %s875_s15 = smov [#allocation3]   ;;  %s776_s19 = scalar_lea.hbm %s1014_s0, 256 }
  0x15   :  { %s21_s16 = sshll.u32 %s875_s15, 4  ;;  %p777_p8 = scmp.ne.s32.totalorder %s1014_s0, %s776_s19  ;;  %s22_s16 = int_to_ptr.vmem [resolvable:$true] %s21_s16 }
  0x16   :  { %p780_p9 = scmp.lt.u32.totalorder %s776_s19, %s1014_s0 }
  0x18   :  { %p782_p10 = pnand %p780_p9, %p777_p8 }
  0x1a   :  { %785 = shalt.err (!%p782_p10)
}
  0x1b   :  { %s786_s24 = scalar_lea.vmem %s22_s16, 256  ;;  %p791_p12 = scmp.lt.s32.totalorder %s22_s16, %s22_s16 }
  0x1c   :  { %p787_p11 = scmp.ne.s32.totalorder %s22_s16, %s786_s24  ;;  %p792_p13 = scmp.lt.s32.totalorder %s786_s24, %s786_s24 }
  0x1e   :  { %p793_p0 = por %p792_p13, %p791_p12 }
  0x20   :  { %p794_p1 = pnand %p793_p0, %p787_p11 }
  0x22   :  { %797 = shalt.err (!%p794_p1)
}
  0x23   :  { %s876_s1 = smov 128   ;;  %s877_s25 = smov 8  }
  0x24   :  { %27 = dma.hbm_to_vmem [thread:$0]  %s1014_s0, 256, %s22_s16, [#allocation4], %s876_s1, %s876_s1, %s877_s25  }
  0x25   :  { %s878_s28 = smov [#allocation8]   ;;  %s879_s30 = smov [#allocation9]  }
  0x26   :  { %s45_s29 = sshll.u32 %s878_s28, 4  ;;  %s57_s8 = sshll.u32 %s879_s30, 4  ;;  %s46_s29 = int_to_ptr.vmem [resolvable:$true] %s45_s29  ;;  %s953_s8 = int_to_ptr.vmem [resolvable:$true] %s57_s8 }
  0x27   :  { %s798_s13 = scalar_lea.hbm %s1016_s2, 2048 }
  0x28   :  { %p799_p2 = scmp.ne.s32.totalorder %s1016_s2, %s798_s13  ;;  %p802_p3 = scmp.lt.u32.totalorder %s798_s13, %s1016_s2 }
  0x2a   :  { %p804_p4 = pnand %p802_p3, %p799_p2 }
  0x2c   :  { %807 = shalt.err (!%p804_p4)
}
  0x2d   :  { %s808_s0 = scalar_lea.vmem %s46_s29, 2048  ;;  %p813_p6 = scmp.lt.s32.totalorder %s46_s29, %s46_s29 }
  0x2e   :  { %p809_p5 = scmp.ne.s32.totalorder %s46_s29, %s808_s0  ;;  %p814_p7 = scmp.lt.s32.totalorder %s808_s0, %s808_s0 }
  0x30   :  { %p815_p8 = por %p814_p7, %p813_p6 }
  0x32   :  { %p816_p9 = pnand %p815_p8, %p809_p5 }
  0x34   :  { %819 = shalt.err (!%p816_p9)
}
  0x35   :  { %51 = dma.hbm_to_vmem [thread:$0]  %s1016_s2, 2048, %s46_s29, [#allocation7], %s873_s11, %s873_s11, %s874_s12  }
  0x36   :  { %s820_s22 = scalar_lea.hbm %s1017_s3, 2048 }
  0x37   :  { %p821_p10 = scmp.ne.s32.totalorder %s1017_s3, %s820_s22  ;;  %p824_p11 = scmp.lt.u32.totalorder %s820_s22, %s1017_s3 }
  0x39   :  { %p826_p12 = pnand %p824_p11, %p821_p10 }
  0x3b   :  { %829 = shalt.err (!%p826_p12)
}
  0x3c   :  { %s830_s28 = scalar_lea.vmem %s953_s8, 2048  ;;  %p835_p0 = scmp.lt.s32.totalorder %s953_s8, %s953_s8 }
  0x3d   :  { %p831_p13 = scmp.ne.s32.totalorder %s953_s8, %s830_s28  ;;  %p836_p1 = scmp.lt.s32.totalorder %s830_s28, %s830_s28 }
  0x3f   :  { %p837_p2 = por %p836_p1, %p835_p0 }
  0x41   :  { %p838_p3 = pnand %p837_p2, %p831_p13 }
  0x43   :  { %841 = shalt.err (!%p838_p3)
}
  0x44   :  { %63 = dma.hbm_to_vmem [thread:$0]  %s1017_s3, 2048, %s953_s8, [#allocation10], %s873_s11, %s873_s11, %s874_s12  }
  0x45   :  { %864 = dma.done.wait [#allocation4], 256  }
  0x46   :  { %865 = vsyncadd [#allocation4], 4294967040 }
  0x47   :  { %866 = dma.done.wait [#allocation7], 3072  }
  0x48   :  { %867 = vsyncadd [#allocation7], 4294964224 }
  0x49   :  { %868 = dma.done.wait [#allocation10], 2048  }
  0x4a   :  { %869 = vsyncadd [#allocation10], 4294965248  ;;  %v880_v0 = vmov 0.0   ;;  %vm881_vm0 = vmmov 0   ;;  %v714_v1 = vld [vmem:[#allocation6] sm:$0xff]   ;;  %v715_v2 = vld [vmem:[#allocation6 + $0x8] sm:$0xff]  }
  0x4b   :  { %683 = vmatprep.subr.bf16.mxu0 %v880_v0  ;;  %699 = vmatprep.mubr.msk.bf16.mxu0 %vm881_vm0, %v880_v0  ;;  %v716_v3 = vld [vmem:[#allocation6 + $0x10] sm:$0xff]   ;;  %v717_v4 = vld [vmem:[#allocation6 + $0x18] sm:$0xff]   ;;  %v722_v5 = vld [vmem:[#allocation8 + $0x40] sm:$0xff]  }
  0x4c   :  { %684 = vmatpush3.bf16.msra.mxu0 %v714_v1  ;;  %v723_v6 = vld [vmem:[#allocation8] sm:$0xff]   ;;  %639 = vmatprep.subr.bf16.mxu1 %v722_v5  ;;  %v724_v7 = vld [vmem:[#allocation8 + $0x48] sm:$0xff]   ;;  %v726_v9 = vld [vmem:[#allocation8 + $0x50] sm:$0xff]  }
  0x4d   :  { %685 = vmatprep.subr.bf16.mxu0 %v880_v0  ;;  %640 = vmatpush3.bf16.msra.mxu1 %v723_v6  ;;  %v725_v8 = vld [vmem:[#allocation8 + $0x8] sm:$0xff]   ;;  %v718_v10 = vld [vmem:[#allocation6 + $0x20] sm:$0xff]   ;;  %v727_v11 = vld [vmem:[#allocation8 + $0x10] sm:$0xff]  }
  0x4e   :  { %641 = vmatprep.subr.bf16.mxu1 %v724_v7  ;;  %v728_v12 = vld [vmem:[#allocation8 + $0x58] sm:$0xff]   ;;  %v719_v13 = vld [vmem:[#allocation6 + $0x28] sm:$0xff]   ;;  %v720_v14 = vld [vmem:[#allocation6 + $0x30] sm:$0xff]  }
  0x4f   :  { %v729_v15 = vld [vmem:[#allocation8 + $0x18] sm:$0xff]   ;;  %v730_v16 = vld [vmem:[#allocation8 + $0x60] sm:$0xff]   ;;  %v732_v18 = vld [vmem:[#allocation8 + $0x68] sm:$0xff]  }
  0x50   :  { %686 = vmatpush3.bf16.msra.mxu0 %v715_v2  ;;  %v731_v17 = vld [vmem:[#allocation8 + $0x20] sm:$0xff]   ;;  %v721_v19 = vld [vmem:[#allocation6 + $0x38] sm:$0xff]   ;;  %v83_v20 = vld [vmem:[#allocation3] sm:$0xff] }
  0x51   :  { %687 = vmatprep.subr.bf16.mxu0 %v880_v0  ;;  %642 = vmatpush3.bf16.msra.mxu1 %v725_v8  ;;  %v84_v21 = vld [vmem:[#allocation3 + $0x8] sm:$0xff]  ;;  %v733_v22 = vld [vmem:[#allocation8 + $0x28] sm:$0xff]   ;;  %v734_v24 = vld [vmem:[#allocation8 + $0x70] sm:$0xff]  }
  0x52   :  { %643 = vmatprep.subr.bf16.mxu1 %v726_v9  ;;  %v85_v23 = vpack.c.bf16 %v84_v21, %v83_v20  ;;  %v735_v25 = vld [vmem:[#allocation8 + $0x30] sm:$0xff]   ;;  %v736_v26 = vld [vmem:[#allocation8 + $0x78] sm:$0xff]   ;;  %v738_v28 = vld [vmem:[#allocation9 + $0x40] sm:$0xff]  }
  0x53   :  { %v737_v27 = vld [vmem:[#allocation8 + $0x38] sm:$0xff]   ;;  %v739_v29 = vld [vmem:[#allocation9] sm:$0xff]   ;;  %v740_v30 = vld [vmem:[#allocation9 + $0x48] sm:$0xff]  }
  0x54   :  { %688 = vmatpush3.bf16.msra.mxu0 %v716_v3  ;;  %v741_v31 = vld [vmem:[#allocation9 + $0x8] sm:$0xff]   ;;  %v742_v32 = vld [vmem:[#allocation9 + $0x50] sm:$0xff]   ;;  %v744_v34 = vld [vmem:[#allocation9 + $0x58] sm:$0xff]  }
  0x55   :  { %689 = vmatprep.subr.bf16.mxu0 %v880_v0  ;;  %644 = vmatpush3.bf16.msra.mxu1 %v727_v11  ;;  %v743_v33 = vld [vmem:[#allocation9 + $0x10] sm:$0xff]   ;;  %v745_v35 = vld [vmem:[#allocation9 + $0x18] sm:$0xff]   ;;  %v746_v36 = vld [vmem:[#allocation9 + $0x60] sm:$0xff]  }
  0x56   :  { %645 = vmatprep.subr.bf16.mxu1 %v728_v12  ;;  %v747_v37 = vld [vmem:[#allocation9 + $0x20] sm:$0xff]   ;;  %v587_v38 = vld [vmem:[%s1018_s4] ss:$0 sm:$0xff]  ;;  %v748_v48 = vld [vmem:[#allocation9 + $0x68] sm:$0xff]  }
  0x57   :  { %v749_v49 = vld [vmem:[#allocation9 + $0x28] sm:$0xff]   ;;  %v750_v50 = vld [vmem:[#allocation9 + $0x70] sm:$0xff]   ;;  %v752_v52 = vld [vmem:[#allocation9 + $0x78] sm:$0xff]  }
  0x58   :  { %690 = vmatpush3.bf16.msra.mxu0 %v717_v4  ;;  %v751_v51 = vld [vmem:[#allocation9 + $0x30] sm:$0xff]   ;;  %v753_v53 = vld [vmem:[#allocation9 + $0x38] sm:$0xff]  }
  0x59   :  { %691 = vmatprep.subr.bf16.mxu0 %v880_v0  ;;  %646 = vmatpush3.bf16.msra.mxu1 %v729_v15  ;;  %v596_v55 = vld [vmem:[%s1019_s5] ss:$0 sm:$0xff]  ;;  %s882_s5 = smov [#allocation11]  }
  0x5a   :  { %647 = vmatprep.subr.bf16.mxu1 %v730_v16  ;;  %v613_v3 = vld [vmem:[%s1020_s6] ss:$0 sm:$0xff]  ;;  %s573_s9 = sshll.u32 %s882_s5, 4  ;;  %s574_s9 = int_to_ptr.vmem [resolvable:$true] %s573_s9 }
  0x5b   :  { %s842_s10 = scalar_lea.vmem %s574_s9, 256  ;;  %p847_p5 = scmp.lt.s32.totalorder %s574_s9, %s574_s9 }
  0x5c   :  { %692 = vmatpush3.bf16.msra.mxu0 %v718_v10  ;;  %p843_p4 = scmp.ne.s32.totalorder %s574_s9, %s842_s10  ;;  %p848_p6 = scmp.lt.s32.totalorder %s842_s10, %s842_s10 }
  0x5d   :  { %693 = vmatprep.subr.bf16.mxu0 %v880_v0  ;;  %648 = vmatpush3.bf16.msra.mxu1 %v731_v17 }
  0x5e   :  { %649 = vmatprep.subr.bf16.mxu1 %v732_v18  ;;  %p849_p7 = por %p848_p6, %p847_p5 }
  0x60   :  { %694 = vmatpush3.bf16.msra.mxu0 %v719_v13  ;;  %p850_p8 = pnand %p849_p7, %p843_p4 }
  0x61   :  { %695 = vmatprep.subr.bf16.mxu0 %v880_v0  ;;  %650 = vmatpush3.bf16.msra.mxu1 %v733_v22 }
  0x62   :  { %651 = vmatprep.subr.bf16.mxu1 %v734_v24 }
  0x64   :  { %696 = vmatpush3.bf16.msra.mxu0 %v720_v14 }
  0x65   :  { %697 = vmatprep.subr.bf16.mxu0 %v880_v0  ;;  %652 = vmatpush3.bf16.msra.mxu1 %v735_v25 }
  0x66   :  { %653 = vmatprep.subr.bf16.mxu1 %v736_v26 }
  0x68   :  { %698 = vmatpush3.bf16.msra.mxu0 %v721_v19 }
  0x69   :  { %654 = vmatpush3.bf16.msra.mxu1 %v737_v27  ;;  %661 = vmatprep.subr.bf16.mxu0 %v738_v28 }
  0x6b   :  { %700 = vmatmul.mubr.bf16.vlgmr.msra.gmra.mrb[0].mxu0 %v85_v23 }
  0x6c   :  { %662 = vmatpush3.bf16.msra.mxu0 %v739_v29 }
  0x6d   :  { %663 = vmatprep.subr.bf16.mxu0 %v740_v30 }
  0x70   :  { %664 = vmatpush3.bf16.msra.mxu0 %v741_v31 }
  0x71   :  { %665 = vmatprep.subr.bf16.mxu0 %v742_v32 }
  0x74   :  { %666 = vmatpush3.bf16.msra.mxu0 %v743_v33 }
  0x75   :  { %667 = vmatprep.subr.bf16.mxu0 %v744_v34 }
  0x78   :  { %668 = vmatpush3.bf16.msra.mxu0 %v745_v35 }
  0x79   :  { %669 = vmatprep.subr.bf16.mxu0 %v746_v36 }
  0x7c   :  { %670 = vmatpush3.bf16.msra.mxu0 %v747_v37 }
  0x7d   :  { %671 = vmatprep.subr.bf16.mxu0 %v748_v48 }
  0x80   :  { %672 = vmatpush3.bf16.msra.mxu0 %v749_v49 }
  0x81   :  { %673 = vmatprep.subr.bf16.mxu0 %v750_v50 }
  0x84   :  { %674 = vmatpush3.bf16.msra.mxu0 %v751_v51 }
  0x85   :  { %675 = vmatprep.subr.bf16.mxu0 %v752_v52 }
  0x88   :  { %676 = vmatpush3.bf16.msra.mxu0 %v753_v53 }
 0x13e   :  { %v193_v39 = vpop.f32.mrb[0].mxu0 }
 0x13f   :  { %v194_v40 = vadd.f32 %v587_v38, %v193_v39  ;;  %v701_v41 = vpop.f32.mrb[1].mxu0 }
 0x140   :  { %v196_v42 = vpop.f32.mrb[2].mxu0 }
 0x141   :  { %v197_v43 = vadd.f32 %v587_v38, %v196_v42  ;;  %v702_v44 = vpop.f32.mrb[3].mxu0  ;;  %v200_v45 = vmax.f32 %v194_v40, 0.0 }
 0x143   :  { %v201_v46 = vmax.f32 %v197_v43, 0.0 }
 0x145   :  { %v202_v47 = vpack.c.bf16 %v201_v46, %v200_v45 }
 0x147   :  { %373 = vmatprep.mubr.bf16.mxu1 %v202_v47 }
 0x148   :  { %374 = vmatmul.mubr.bf16.vlgmr.msra.gmra.mrb[0].mxu1 %v85_v23 }
 0x21b   :  { %v655_v54 = vpop.f32.mrb[0].mxu1 }
 0x21c   :  { %v656_v56 = vpop.f32.mrb[1].mxu1 }
 0x21d   :  { %v657_v57 = vadd.f32 %v656_v56, %v655_v54  ;;  %v658_v58 = vpop.f32.mrb[2].mxu1 }
 0x21e   :  { %v659_v59 = vpop.f32.mrb[3].mxu1 }
 0x21f   :  { %v376_v60 = vadd.f32 %v657_v57, %v596_v55  ;;  %v660_v61 = vadd.f32 %v659_v59, %v658_v58 }
 0x221   :  { %v379_v62 = vadd.f32 %v660_v61, %v596_v55  ;;  %v382_v63 = vmax.f32 %v376_v60, 0.0 }
 0x223   :  { %v383_v0 = vmax.f32 %v379_v62, 0.0 }
 0x225   :  { %v384_v1 = vpack.c.bf16 %v383_v0, %v382_v63 }
 0x227   :  { %555 = vmatprep.mubr.bf16.mxu0 %v384_v1 }
 0x228   :  { %556 = vmatmul.mubr.bf16.vlgmr.msra.gmra.mrb[4].mxu0 %v202_v47 }
 0x2fb   :  { %v677_v2 = vpop.f32.mrb[4].mxu0 }
 0x2fc   :  { %v678_v4 = vpop.f32.mrb[5].mxu0 }
 0x2fd   :  { %v679_v5 = vadd.f32 %v678_v4, %v677_v2  ;;  %v680_v6 = vpop.f32.mrb[6].mxu0 }
 0x2fe   :  { %v681_v7 = vpop.f32.mrb[7].mxu0 }
 0x2ff   :  { %v558_v8 = vadd.f32 %v679_v5, %v613_v3  ;;  %v682_v9 = vadd.f32 %v681_v7, %v680_v6 }
 0x301   :  { %v564_v10 = vmax.f32 %v558_v8, 0.0  ;;  %v561_v11 = vadd.f32 %v682_v9, %v613_v3 }
 0x303   :  { %566 = vst [vmem:[#allocation11] sm:$0xff] %v564_v10  ;;  %v565_v12 = vmax.f32 %v561_v11, 0.0 }
 0x305   :  { %567 = vst [vmem:[#allocation11 + $0x8] sm:$0xff] %v565_v12 }
 0x306   :  { %853 = shalt.err (!%p850_p8)
}
 0x307   :  { %s854_s14 = scalar_lea.hbm %s1021_s7, 256 }
 0x308   :  { %p855_p9 = scmp.ne.s32.totalorder %s1021_s7, %s854_s14  ;;  %p858_p10 = scmp.lt.u32.totalorder %s854_s14, %s1021_s7 }
 0x30a   :  { %p860_p11 = pnand %p858_p10, %p855_p9 }
 0x30c   :  { %863 = shalt.err (!%p860_p11)
}
 0x30d   :  { %579 = dma.vmem_to_hbm [thread:$0]  %s574_s9, 256, %s1021_s7, [#allocation5], %s876_s1, %s876_s1, %s877_s25  }
 0x30e   :  { %870 = dma.done.wait [#allocation5], 256  }
 0x30f   :  { %871 = vsyncadd [#allocation5], 4294967040 }
 0x310   :  { %583 = vsyncpa [#allocation4], 1 }
 0x311   :  { %584 = vsyncpa [#allocation7], 1 }
 0x312   :  { %585 = vsyncpa [#allocation10], 1 }
 0x313   :  { %586 = vsyncpa [#allocation5], 1 }

</bundles_post_ra>
